<compile_context>
chip_gen: v7x
topology: tpu7x:2x2x1
jax: 0.10.0
libtpu: 0.0.40
codegen_flags: <defaults>
</compile_context>

<pallas_src>
import functools

import jax
import jax.numpy as jnp
from jax.experimental import pallas as pl
from jax.experimental.pallas import tpu as pltpu

EPS = 1e-5


def _conv_bn_add_relu_kernel(w_ref, x_ref, gamma_ref, beta_ref, res_ref, o_ref,
                             *, inv_m):
    # 1x1 conv (stride handled in the wrapper) == matmul over channels.
    # bf16 operands, f32 accumulation on the MXU.  Padded lanes of x are zero,
    # so the corresponding columns of y are zero and do not perturb s1/s2.
    y = jnp.dot(w_ref[...], x_ref[...], preferred_element_type=jnp.float32)  # [Cout, Mp]

    # BatchNorm2d training-mode (biased) batch stats over (N, H, W) == lane axis,
    # single pass: E[y], E[y^2].  inv_m is 1/M_valid (static Python float).
    s1 = jnp.sum(y, axis=1, keepdims=True)                   # [Cout, 1]
    s2 = jnp.sum(y * y, axis=1, keepdims=True)               # [Cout, 1]
    mean = s1 * inv_m
    var = s2 * inv_m - mean * mean

    # Fold gamma/beta into a single per-channel scale/shift -> one FMA-shaped pass.
    scale = gamma_ref[...] * jax.lax.rsqrt(var + EPS)         # [Cout, 1]
    shift = beta_ref[...] - mean * scale                      # [Cout, 1]

    out = y * scale + shift + res_ref[...]                    # [Cout, Mp]
    o_ref[...] = jnp.maximum(out, 0.0).astype(o_ref.dtype)
    # TODO(synk): running_mean/running_var momentum update is training-time module
    # state that does not affect this forward output; omitted.


def make_conv_bn_add_relu(w_oihw, gamma, beta, *, stride=2):
    """Factory: hoists parameter prep out of the per-call path and returns a jitted
    forward(x_nchw, res_nchw) -> out_nchw."""
    Cout, Cin = int(w_oihw.shape[0]), int(w_oihw.shape[1])

    # Hoisted, done once: weight reshape + bf16 cast, gamma/beta reshape.
    w2d = jnp.asarray(jnp.reshape(w_oihw, (Cout, Cin)), dtype=jnp.bfloat16)
    gamma2d = jnp.asarray(jnp.reshape(gamma, (Cout, 1)), dtype=jnp.float32)
    beta2d = jnp.asarray(jnp.reshape(beta, (Cout, 1)), dtype=jnp.float32)

    @jax.jit
    def fwd(x_nchw, res_nchw):
        N = x_nchw.shape[0]

        # stride-2 1x1 conv == spatial subsample (fuses with the transpose/cast/pad
        # into a single producer fusion inside this jit).
        xs = x_nchw[:, :, ::stride, ::stride]                 # [N, Cin, Ho, Wo]
        Ho, Wo = xs.shape[2], xs.shape[3]
        M = N * Ho * Wo
        Mp = ((M + 127) // 128) * 128                          # lane-aligned width
        pad = Mp - M

        # For N == 1 these transposes are no-op reshapes (no data movement).
        x2d = jnp.transpose(xs, (1, 0, 2, 3)).reshape(Cin, M).astype(jnp.bfloat16)
        x2d = jnp.pad(x2d, ((0, 0), (0, pad)))                 # zero lanes -> exact stats
        res2d = jnp.transpose(res_nchw, (1, 0, 2, 3)).reshape(Cout, M)
        res2d = jnp.pad(res2d.astype(jnp.float32), ((0, 0), (0, pad)))

        kernel = functools.partial(_conv_bn_add_relu_kernel, inv_m=1.0 / M)

        cost = pl.CostEstimate(
            flops=2 * Cout * Cin * M,
            transcendentals=Cout,                              # rsqrt per channel
            bytes_accessed=(w2d.size * 2 + x2d.size * 2 + res2d.size * 4
                            + Cout * Mp * 4 + 2 * Cout * 4),
        )

        out2d = pl.pallas_call(
            kernel,
            out_shape=jax.ShapeDtypeStruct((Cout, Mp), jnp.float32),
            in_specs=[pl.BlockSpec(memory_space=pltpu.MemorySpace.VMEM)] * 5,
            out_specs=pl.BlockSpec(memory_space=pltpu.MemorySpace.VMEM),
            input_output_aliases={4: 0},                       # donate res buffer
            cost_estimate=cost,
        )(w2d, x2d, gamma2d, beta2d, res2d)

        # Drop the padded lanes; free reshape back to NCHW for N == 1.
        out2d = out2d[:, :M]
        return jnp.transpose(out2d.reshape(Cout, N, Ho, Wo),
                             (1, 0, 2, 3)).astype(x_nchw.dtype)

    return fwd


if __name__ == "__main__":
    key = jax.random.PRNGKey(0)
    k_x37, k_x47, k_w, k_g, k_b = jax.random.split(key, 5)

    # Shapes exactly as the PyTorch module's forward implies.
    x37 = jax.random.normal(k_x37, (1, 64, 28, 28), dtype=jnp.float32)
    x47 = jax.random.normal(k_x47, (1, 160, 14, 14), dtype=jnp.float32)

    # Deterministic parameter init (Conv2d weight [Cout, Cin, 1, 1]; BN affine params).
    w = jax.random.normal(k_w, (160, 64, 1, 1), dtype=jnp.float32) * 0.05
    gamma = 1.0 + 0.1 * jax.random.normal(k_g, (160,), dtype=jnp.float32)
    beta = 0.05 * jax.random.normal(k_b, (160,), dtype=jnp.float32)

    fwd = make_conv_bn_add_relu(w, gamma, beta, stride=2)
    out = jax.block_until_ready(fwd(x37, x47))
    assert out.shape == (1, 160, 14, 14), out.shape

    # Pure-JAX f32 reference (two-pass BN) for a correctness sanity check.
    def ref(x, w, gamma, beta, res):
        xs = x[:, :, ::2, ::2]
        y = jax.lax.conv_general_dilated(
            xs, w, (1, 1), "VALID", dimension_numbers=("NCHW", "OIHW", "NCHW"))
        mean = jnp.mean(y, axis=(0, 2, 3), keepdims=True)
        var = jnp.mean(jnp.square(y - mean), axis=(0, 2, 3), keepdims=True)
        y = (y - mean) * jax.lax.rsqrt(var + EPS)
        y = y * gamma.reshape(1, -1, 1, 1) + beta.reshape(1, -1, 1, 1)
        return jnp.maximum(y + res, 0.0)

    expected = ref(x37, w, gamma, beta, x47)
    max_err = float(jnp.max(jnp.abs(out - expected)))
    assert max_err < 5e-2, max_err
    print("KERNEL_OK")
</pallas_src>

<mosaic_0001>
module attributes {stable_mosaic.version = 11 : i64} {
  func.func @_conv_bn_add_relu_kernel(%arg0: memref<160x64xbf16, #tpu.memory_space<vmem>>, %arg1: memref<64x256xbf16, #tpu.memory_space<vmem>>, %arg2: memref<160x1xf32, #tpu.memory_space<vmem>>, %arg3: memref<160x1xf32, #tpu.memory_space<vmem>>, %arg4: memref<160x256xf32, #tpu.memory_space<vmem>>, %arg5: memref<160x256xf32, #tpu.memory_space<vmem>>) attributes {dimension_semantics = [], scalar_prefetch = 0 : i64, scratch_operands = 0 : i64, tpu.core_type = #tpu.core_type<tc>} {
    %c0 = arith.constant 0 : index
    %c0_0 = arith.constant 0 : index
    %0 = vector.load %arg0[%c0, %c0_0] : memref<160x64xbf16, #tpu.memory_space<vmem>>, vector<160x64xbf16>
    %c0_1 = arith.constant 0 : index
    %c0_2 = arith.constant 0 : index
    %1 = vector.load %arg1[%c0_1, %c0_2] : memref<64x256xbf16, #tpu.memory_space<vmem>>, vector<64x256xbf16>
    %cst = arith.constant dense<0.000000e+00> : vector<160x256xf32>
    %2 = tpu.matmul %0, %1, %cst {dimension_numbers = #tpu.dot_dimension_numbers<[1], [0], [0], [1], [0, 0, 1, 1], [], []>} : vector<160x64xbf16>, vector<64x256xbf16>, vector<160x256xf32> -> vector<160x256xf32>
    %cst_3 = arith.constant dense<0.000000e+00> : vector<160xf32>
    %3 = vector.multi_reduction <add>, %2, %cst_3 [1] : vector<160x256xf32> to vector<160xf32>
    %4 = vector.shape_cast %3 : vector<160xf32> to vector<160x1xf32>
    %5 = arith.mulf %2, %2 : vector<160x256xf32>
    %cst_4 = arith.constant dense<0.000000e+00> : vector<160xf32>
    %6 = vector.multi_reduction <add>, %5, %cst_4 [1] : vector<160x256xf32> to vector<160xf32>
    %7 = vector.shape_cast %6 : vector<160xf32> to vector<160x1xf32>
    %cst_5 = arith.constant 0.00510204071 : f32
    %8 = vector.broadcast %cst_5 : f32 to vector<160x1xf32>
    %9 = arith.mulf %4, %8 : vector<160x1xf32>
    %cst_6 = arith.constant 0.00510204071 : f32
    %10 = vector.broadcast %cst_6 : f32 to vector<160x1xf32>
    %11 = arith.mulf %7, %10 : vector<160x1xf32>
    %12 = arith.mulf %9, %9 : vector<160x1xf32>
    %13 = arith.subf %11, %12 : vector<160x1xf32>
    %c0_7 = arith.constant 0 : index
    %c0_8 = arith.constant 0 : index
    %14 = vector.load %arg2[%c0_7, %c0_8] : memref<160x1xf32, #tpu.memory_space<vmem>>, vector<160x1xf32>
    %cst_9 = arith.constant 9.99999974E-6 : f32
    %15 = vector.broadcast %cst_9 : f32 to vector<160x1xf32>
    %16 = arith.addf %13, %15 : vector<160x1xf32>
    %17 = math.rsqrt %16 : vector<160x1xf32>
    %18 = arith.mulf %14, %17 : vector<160x1xf32>
    %c0_10 = arith.constant 0 : index
    %c0_11 = arith.constant 0 : index
    %19 = vector.load %arg3[%c0_10, %c0_11] : memref<160x1xf32, #tpu.memory_space<vmem>>, vector<160x1xf32>
    %20 = arith.mulf %9, %18 : vector<160x1xf32>
    %21 = arith.subf %19, %20 : vector<160x1xf32>
    %22 = vector.broadcast %18 : vector<160x1xf32> to vector<160x256xf32>
    %23 = arith.mulf %2, %22 : vector<160x256xf32>
    %24 = vector.broadcast %21 : vector<160x1xf32> to vector<160x256xf32>
    %25 = arith.addf %23, %24 : vector<160x256xf32>
    %c0_12 = arith.constant 0 : index
    %c0_13 = arith.constant 0 : index
    %26 = vector.load %arg4[%c0_12, %c0_13] : memref<160x256xf32, #tpu.memory_space<vmem>>, vector<160x256xf32>
    %27 = arith.addf %25, %26 : vector<160x256xf32>
    %cst_14 = arith.constant 0.000000e+00 : f32
    %28 = vector.broadcast %cst_14 : f32 to vector<160x256xf32>
    %29 = arith.maximumf %27, %28 : vector<160x256xf32>
    %c0_15 = arith.constant 0 : index
    %c0_16 = arith.constant 0 : index
    %30 = vector.load %arg5[%c0_15, %c0_16] : memref<160x256xf32, #tpu.memory_space<vmem>>, vector<160x256xf32>
    tpu.vector_store %arg5[%c0_15, %c0_16], %29 {strides = array<i32>} : memref<160x256xf32, #tpu.memory_space<vmem>>, vector<160x256xf32>,
    return
  }
}

</mosaic_0001>

<bundles_post_ra>
// kernel: fwd.1
= control target key start
LH: loop header
LB: loop body
LE: loop exit
PB: predicated region body
PF: predicated region fallthrough
CT: control target
= control target key end

     0   :  { %v1228_v1 = vmov 0   ;;  %vm139_vm0 = vcmask 523264   ;;  %s2044_s1 = inlined_call_operand.vmem [shape: bf16[64,256], index: 1, kind: input, shape index: {}]   ;;  %s2045_s0 = inlined_call_operand.vmem [shape: bf16[160,64], index: 0, kind: input, shape index: {}]   ;;  %s2046_s2 = inlined_call_operand.vmem [shape: f32[160,1], index: 2, kind: input, shape index: {}]   ;;  %s2047_s3 = inlined_call_operand.vmem [shape: f32[160,1], index: 3, kind: input, shape index: {}]   ;;  %s2048_s4 = inlined_call_operand.vmem [shape: f32[160,256], index: 4, kind: input, shape index: {}, may-alias: {4,5}]   ;;  %s2049_s5 = inlined_call_operand.vmem [shape: f32[160,256], index: 5, kind: output, shape index: {}, may-alias: {4,5}]  }
   0x1   :  { %v1166_v0 = vld [vmem:[%s2044_s1 + $0x4] ss:$8 sps:$4 sm:$0xff]   ;;  %202 = vmatprep.mubr.bf16.mxu0 %v1228_v1  ;;  %252 = vmatprep.mubr.bf16.mxu1 %v1228_v1  ;;  %v1168_v2 = vld [vmem:[%s2044_s1] ss:$8 sps:$4 sm:$0xff]   ;;  %v1169_v3 = vld [vmem:[%s2044_s1 + $0x14] ss:$8 sps:$4 sm:$0xff]  }
   0x2   :  { %1164 = vset.pattern.permute.xlu0 %v1228_v1  ;;  %1165 = vset.pattern.permute.xlu1 %v1228_v1  ;;  %v1171_v4 = vld [vmem:[%s2044_s1 + $0x10] ss:$8 sps:$4 sm:$0xff]   ;;  %v1172_v5 = vld [vmem:[%s2044_s1 + $0x24] ss:$8 sps:$4 sm:$0xff]   ;;  %v1174_v6 = vld [vmem:[%s2044_s1 + $0x20] ss:$8 sps:$4 sm:$0xff]  }
   0x3   :  { %170 = vmatprep.subr.bf16.mxu0 %v1166_v0  ;;  %1155 = vmatprep.subr.bf16.mxu1 %v1166_v0  ;;  %v1175_v7 = vld [vmem:[%s2044_s1 + $0x34] ss:$8 sps:$4 sm:$0xff]   ;;  %v1177_v8 = vld [vmem:[%s2044_s1 + $0x30] ss:$8 sps:$4 sm:$0xff]   ;;  %v1178_v9 = vld [vmem:[%s2045_s0] sm:$0xff]  }
   0x4   :  { %171 = vmatpush1.bf16.msra.mxu0 %v1168_v2  ;;  %1159 = vmatpush1.bf16.msra.mxu1 %v1168_v2  ;;  %v1179_v10 = vld [vmem:[%s2045_s0 + $0x28] sm:$0xff]   ;;  %v1181_v12 = vld [vmem:[%s2045_s0 + $0x30] sm:$0xff]   ;;  %v1183_v14 = vld [vmem:[%s2045_s0 + $0x38] sm:$0xff]  }
   0x5   :  { %172 = vmatprep.subr.bf16.mxu0 %v1169_v3  ;;  %1156 = vmatprep.subr.bf16.mxu1 %v1169_v3  ;;  %v1180_v11 = vld [vmem:[%s2045_s0 + $0x8] sm:$0xff]   ;;  %v1182_v13 = vld [vmem:[%s2045_s0 + $0x10] sm:$0xff]   ;;  %v1184_v15 = vld [vmem:[%s2045_s0 + $0x18] sm:$0xff]  }
   0x6   :  { %v1185_v16 = vld [vmem:[%s2045_s0 + $0x40] sm:$0xff]   ;;  %v1187_v18 = vld [vmem:[%s2045_s0 + $0x48] sm:$0xff]  }
   0x7   :  { %v1186_v17 = vld [vmem:[%s2045_s0 + $0x20] sm:$0xff]  }
   0x8   :  { %173 = vmatpush1.bf16.msra.mxu0 %v1171_v4  ;;  %1160 = vmatpush1.bf16.msra.mxu1 %v1171_v4 }
   0x9   :  { %174 = vmatprep.subr.bf16.mxu0 %v1172_v5  ;;  %1157 = vmatprep.subr.bf16.mxu1 %v1172_v5 }
   0xc   :  { %175 = vmatpush1.bf16.msra.mxu0 %v1174_v6  ;;  %1161 = vmatpush1.bf16.msra.mxu1 %v1174_v6 }
   0xd   :  { %176 = vmatprep.subr.bf16.mxu0 %v1175_v7  ;;  %1158 = vmatprep.subr.bf16.mxu1 %v1175_v7 }
  0x10   :  { %177 = vmatpush1.bf16.msra.mxu0 %v1177_v8  ;;  %1162 = vmatpush1.bf16.msra.mxu1 %v1177_v8 }
  0x13   :  { %1145 = vmatmul.mubr.msk.bf16.vlgmr.msra.gmra.mrb[0].mxu0 %vm139_vm0, %v1178_v9  ;;  %1150 = vmatmul.mubr.msk.bf16.vlgmr.msra.gmra.mrb[0].mxu1 %vm139_vm0, %v1179_v10 }
  0x14   :  { %212 = vmatprep.mubr.bf16.mxu0 %v1228_v1  ;;  %262 = vmatprep.mubr.bf16.mxu1 %v1228_v1 }
  0x1b   :  { %1146 = vmatmul.mubr.msk.bf16.gmra.mrb[4].mxu0 %vm139_vm0, %v1180_v11  ;;  %1151 = vmatmul.mubr.msk.bf16.gmra.mrb[4].mxu1 %vm139_vm0, %v1181_v12 }
  0x1c   :  { %222 = vmatprep.mubr.bf16.mxu0 %v1228_v1  ;;  %272 = vmatprep.mubr.bf16.mxu1 %v1228_v1 }
  0x23   :  { %1147 = vmatmul.mubr.msk.bf16.gmra.mrb[8].mxu0 %vm139_vm0, %v1182_v13  ;;  %1152 = vmatmul.mubr.msk.bf16.gmra.mrb[8].mxu1 %vm139_vm0, %v1183_v14 }
  0x24   :  { %232 = vmatprep.mubr.bf16.mxu0 %v1228_v1  ;;  %282 = vmatprep.mubr.bf16.mxu1 %v1228_v1 }
  0x2b   :  { %1148 = vmatmul.mubr.msk.bf16.gmra.mrb[12].mxu0 %vm139_vm0, %v1184_v15  ;;  %1153 = vmatmul.mubr.msk.bf16.gmra.mrb[12].mxu1 %vm139_vm0, %v1185_v16 }
  0x2c   :  { %242 = vmatprep.mubr.bf16.mxu0 %v1228_v1  ;;  %292 = vmatprep.mubr.bf16.mxu1 %v1228_v1 }
  0x33   :  { %1149 = vmatmul.mubr.msk.bf16.gmra.mrb[16].mxu0 %vm139_vm0, %v1186_v17  ;;  %1154 = vmatmul.mubr.msk.bf16.gmra.mrb[16].mxu1 %vm139_vm0, %v1187_v18 }
  0xe6   :  { %v1323_v19 = vpop.f32.mrb[0].mxu0  ;;  %v1325_v20 = vpop.f32.mrb[0].mxu1 }
  0xe7   :  { %v1327_v21 = vpop.f32.mrb[1].mxu0  ;;  %v1329_v22 = vpop.f32.mrb[1].mxu1  ;;  %v363_v23 = vmul.f32 %v1323_v19, %v1323_v19  ;;  %v383_v24 = vmul.f32 %v1325_v20, %v1325_v20 }
  0xe8   :  { %v1335_v25 = vpop.f32.mrb[2].mxu0  ;;  %v1337_v26 = vpop.f32.mrb[2].mxu1  ;;  %v303_v27 = vadd.f32 %v1327_v21, %v1323_v19  ;;  %v333_v28 = vadd.f32 %v1329_v22, %v1325_v20  ;;  %v364_v29 = vmul.f32 %v1327_v21, %v1327_v21  ;;  %v384_v30 = vmul.f32 %v1329_v22, %v1329_v22 }
  0xe9   :  { %v1347_v31 = vpop.f32.mrb[3].mxu0  ;;  %v1349_v32 = vpop.f32.mrb[3].mxu1  ;;  %v365_v33 = vmul.f32 %v1335_v25, %v1335_v25  ;;  %v385_v34 = vmul.f32 %v1337_v26, %v1337_v26 }
  0xea   :  { %304 = vadd.xlane.f32.xlu0 %v303_v27  ;;  %v336_v35 = vadd.f32 %v1349_v32, %v1337_v26  ;;  %v366_v36 = vmul.f32 %v1347_v31, %v1347_v31  ;;  %v306_v37 = vadd.f32 %v1347_v31, %v1335_v25  ;;  %v386_v38 = vmul.f32 %v1349_v32, %v1349_v32 }
  0xeb   :  { %v403_v39 = vadd.f32 %v364_v29, %v363_v23  ;;  %v433_v40 = vadd.f32 %v384_v30, %v383_v24 }
  0xec   :  { %337 = vadd.xlane.f32.xlu1 %v336_v35  ;;  %v406_v41 = vadd.f32 %v366_v36, %v365_v33  ;;  %v436_v42 = vadd.f32 %v386_v38, %v385_v34 }
  0xee   :  { %334 = vadd.xlane.f32.xlu0 %v333_v28  ;;  %v1363_v43 = vpop.f32.mrb[4].mxu0  ;;  %v1365_v44 = vpop.f32.mrb[4].mxu1 }
  0xef   :  { %v1367_v45 = vpop.f32.mrb[5].mxu0  ;;  %v1369_v46 = vpop.f32.mrb[5].mxu1  ;;  %v367_v47 = vmul.f32 %v1363_v43, %v1363_v43  ;;  %v387_v48 = vmul.f32 %v1365_v44, %v1365_v44 }
  0xf0   :  { %407 = vadd.xlane.f32.xlu1 %v406_v41  ;;  %v309_v49 = vadd.f32 %v1367_v45, %v1363_v43  ;;  %v1377_v50 = vpop.f32.mrb[6].mxu0  ;;  %v1379_v51 = vpop.f32.mrb[6].mxu1  ;;  %v339_v52 = vadd.f32 %v1369_v46, %v1365_v44  ;;  %v368_v53 = vmul.f32 %v1367_v45, %v1367_v45  ;;  %v388_v54 = vmul.f32 %v1369_v46, %v1369_v46 }
  0xf1   :  { %v1387_v55 = vpop.f32.mrb[7].mxu0  ;;  %v1389_v56 = vpop.f32.mrb[7].mxu1  ;;  %v369_v57 = vmul.f32 %v1377_v50, %v1377_v50  ;;  %v389_v58 = vmul.f32 %v1379_v51, %v1379_v51 }
  0xf2   :  { %307 = vadd.xlane.f32.xlu0 %v306_v37  ;;  %v312_v59 = vadd.f32 %v1387_v55, %v1377_v50  ;;  %v342_v60 = vadd.f32 %v1389_v56, %v1379_v51  ;;  %v409_v61 = vadd.f32 %v368_v53, %v367_v47  ;;  %v370_v62 = vmul.f32 %v1387_v55, %v1387_v55 }
  0xf3   :  { %v439_v63 = vadd.f32 %v388_v54, %v387_v48  ;;  %v390_v0 = vmul.f32 %v1389_v56, %v1389_v56 }
  0xf4   :  { %437 = vadd.xlane.f32.xlu1 %v436_v42  ;;  %v412_v1 = vadd.f32 %v370_v62, %v369_v57 }
  0xf5   :  { %v1403_v2 = vadd.f32 %v390_v0, %v389_v58 }
  0xf6   :  { %404 = vadd.xlane.f32.xlu0 %v403_v39  ;;  %v1405_v3 = vpop.f32.mrb[8].mxu0  ;;  %v1407_v4 = vpop.f32.mrb[8].mxu1 }
  0xf7   :  { %v1409_v5 = vpop.f32.mrb[9].mxu0  ;;  %v1411_v6 = vpop.f32.mrb[9].mxu1  ;;  %v371_v7 = vmul.f32 %v1405_v3, %v1405_v3  ;;  %v391_v8 = vmul.f32 %v1407_v4, %v1407_v4 }
  0xf8   :  { %310 = vadd.xlane.f32.xlu1 %v309_v49  ;;  %v1417_v9 = vpop.f32.mrb[10].mxu0  ;;  %v1421_v10 = vadd.f32 %v1409_v5, %v1405_v3  ;;  %v1423_v11 = vpop.f32.mrb[10].mxu1  ;;  %v1427_v12 = vadd.f32 %v1411_v6, %v1407_v4  ;;  %v372_v13 = vmul.f32 %v1409_v5, %v1409_v5  ;;  %v392_v14 = vmul.f32 %v1411_v6, %v1411_v6 }
  0xf9   :  { %v1433_v15 = vpop.f32.mrb[11].mxu0  ;;  %v1435_v16 = vpop.f32.mrb[11].mxu1  ;;  %v373_v17 = vmul.f32 %v1417_v9, %v1417_v9  ;;  %v393_v18 = vmul.f32 %v1423_v11, %v1423_v11 }
  0xfa   :  { %434 = vadd.xlane.f32.xlu0 %v433_v40  ;;  %v318_v23 = vadd.f32 %v1433_v15, %v1417_v9  ;;  %v1445_v24 = vadd.f32 %v1435_v16, %v1423_v11  ;;  %v1447_v27 = vadd.f32 %v372_v13, %v371_v7  ;;  %v374_v28 = vmul.f32 %v1433_v15, %v1433_v15 }
  0xfb   :  { %v1451_v29 = vadd.f32 %v392_v14, %v391_v8  ;;  %v394_v30 = vmul.f32 %v1435_v16, %v1435_v16 }
  0xfc   :  { %313 = vadd.xlane.f32.xlu1 %v312_v59  ;;  %v418_v33 = vadd.f32 %v374_v28, %v373_v17 }
  0xfd   :  { %v448_v34 = vadd.f32 %v394_v30, %v393_v18 }
  0xfe   :  { %340 = vadd.xlane.f32.xlu0 %v339_v52  ;;  %v1455_v35 = vpop.f32.mrb[12].mxu0  ;;  %v1457_v36 = vpop.f32.mrb[12].mxu1 }
  0xff   :  { %2058 = vst [vmem:[#allocation2_spill] sm:$0xff] %v1455_v35  ;;  %2059 = vst [vmem:[#allocation3_spill] sm:$0xff] %v1457_v36  ;;  %v1459_v37 = vpop.f32.mrb[13].mxu0  ;;  %v1461_v38 = vpop.f32.mrb[13].mxu1  ;;  %v375_v39 = vmul.f32 %v1455_v35, %v1455_v35  ;;  %v395_v40 = vmul.f32 %v1457_v36, %v1457_v36 }
 0x100   :  { %2060 = vst [vmem:[#allocation4_spill] sm:$0xff] %v1459_v37  ;;  %2061 = vst [vmem:[#allocation5_spill] sm:$0xff] %v1461_v38  ;;  %343 = vadd.xlane.f32.xlu1 %v342_v60  ;;  %v1467_v41 = vpop.f32.mrb[14].mxu0  ;;  %v321_v42 = vadd.f32 %v1459_v37, %v1455_v35  ;;  %v1471_v47 = vpop.f32.mrb[14].mxu1  ;;  %v351_v48 = vadd.f32 %v1461_v38, %v1457_v36  ;;  %v376_v49 = vmul.f32 %v1459_v37, %v1459_v37 }
 0x101   :  { %v396_v52 = vmul.f32 %v1461_v38, %v1461_v38  ;;  %v1479_v53 = vpop.f32.mrb[15].mxu0  ;;  %v1481_v54 = vpop.f32.mrb[15].mxu1  ;;  %v377_v57 = vmul.f32 %v1467_v41, %v1467_v41  ;;  %v397_v58 = vmul.f32 %v1471_v47, %v1471_v47 }
 0x102   :  { %410 = vadd.xlane.f32.xlu0 %v409_v61  ;;  %v324_v59 = vadd.f32 %v1479_v53, %v1467_v41  ;;  %v354_v60 = vadd.f32 %v1481_v54, %v1471_v47  ;;  %v421_v62 = vadd.f32 %v376_v49, %v375_v39  ;;  %v378_v0 = vmul.f32 %v1479_v53, %v1479_v53 }
 0x103   :  { %v451_v7 = vadd.f32 %v396_v52, %v395_v40  ;;  %v398_v8 = vmul.f32 %v1481_v54, %v1481_v54 }
 0x104   :  { %413 = vadd.xlane.f32.xlu1 %v412_v1  ;;  %v424_v13 = vadd.f32 %v378_v0, %v377_v57 }
 0x105   :  { %v454_v14 = vadd.f32 %v398_v8, %v397_v58 }
 0x106   :  { %440 = vadd.xlane.f32.xlu0 %v439_v63  ;;  %v1495_v17 = vpop.f32.mrb[16].mxu0  ;;  %v1497_v61 = vpop.f32.mrb[16].mxu1 }
 0x107   :  { %2062 = vst [vmem:[#allocation6_spill] sm:$0xff] %v1495_v17  ;;  %2063 = vst [vmem:[#allocation7_spill] sm:$0xff] %v1497_v61  ;;  %v1499_v18 = vpop.f32.mrb[17].mxu0  ;;  %v1501_v28 = vpop.f32.mrb[17].mxu1  ;;  %v379_v30 = vmul.f32 %v1495_v17, %v1495_v17  ;;  %v399_v39 = vmul.f32 %v1497_v61, %v1497_v61 }
 0x108   :  { %2064 = vst [vmem:[#allocation8_spill] sm:$0xff] %v1499_v18  ;;  %2065 = vst [vmem:[#allocation9_spill] sm:$0xff] %v1501_v28  ;;  %443 = vadd.xlane.f32.xlu1 %v1403_v2  ;;  %v1508_v1 = vpop.f32.mrb[18].mxu0  ;;  %v327_v63 = vadd.f32 %v1499_v18, %v1495_v17  ;;  %v1512_v40 = vpop.f32.mrb[18].mxu1  ;;  %v357_v49 = vadd.f32 %v1501_v28, %v1497_v61  ;;  %v380_v52 = vmul.f32 %v1499_v18, %v1499_v18 }
 0x109   :  { %v400_v57 = vmul.f32 %v1501_v28, %v1501_v28  ;;  %v1520_v58 = vpop.f32.mrb[19].mxu0  ;;  %v1522_v0 = vpop.f32.mrb[19].mxu1  ;;  %v381_v2 = vmul.f32 %v1508_v1, %v1508_v1  ;;  %v401_v8 = vmul.f32 %v1512_v40, %v1512_v40 }
 0x10a   :  { %316 = vadd.xlane.f32.xlu0 %v1421_v10  ;;  %v382_v61 = vmul.f32 %v1520_v58, %v1520_v58  ;;  %v330_v18 = vadd.f32 %v1520_v58, %v1508_v1  ;;  %v402_v28 = vmul.f32 %v1522_v0, %v1522_v0  ;;  %v360_v17 = vadd.f32 %v1522_v0, %v1512_v40 }
 0x10b   :  { %v427_v38 = vadd.f32 %v380_v52, %v379_v30  ;;  %v457_v36 = vadd.f32 %v400_v57, %v399_v39 }
 0x10c   :  { %319 = vadd.xlane.f32.xlu1 %v318_v23  ;;  %v430_v37 = vadd.f32 %v382_v61, %v381_v2  ;;  %v460_v35 = vadd.f32 %v402_v28, %v401_v8 }
 0x10e   :  { %346 = vadd.xlane.f32.xlu0 %v1427_v12 }
 0x110   :  { %349 = vadd.xlane.f32.xlu1 %v1445_v24 }
 0x112   :  { %416 = vadd.xlane.f32.xlu0 %v1447_v27 }
 0x114   :  { %419 = vadd.xlane.f32.xlu1 %v418_v33 }
 0x116   :  { %446 = vadd.xlane.f32.xlu0 %v1451_v29 }
 0x118   :  { %449 = vadd.xlane.f32.xlu1 %v448_v34 }
 0x11a   :  { %322 = vadd.xlane.f32.xlu0 %v321_v42 }
 0x11c   :  { %325 = vadd.xlane.f32.xlu1 %v324_v59 }
 0x11e   :  { %352 = vadd.xlane.f32.xlu0 %v351_v48 }
 0x120   :  { %355 = vadd.xlane.f32.xlu1 %v354_v60 }
 0x122   :  { %422 = vadd.xlane.f32.xlu0 %v421_v62 }
 0x124   :  { %425 = vadd.xlane.f32.xlu1 %v424_v13 }
 0x126   :  { %452 = vadd.xlane.f32.xlu0 %v451_v7 }
 0x128   :  { %455 = vadd.xlane.f32.xlu1 %v454_v14 }
 0x12a   :  { %328 = vadd.xlane.f32.xlu0 %v327_v63 }
 0x12c   :  { %331 = vadd.xlane.f32.xlu1 %v330_v18 }
 0x12e   :  { %358 = vadd.xlane.f32.xlu0 %v357_v49 }
 0x130   :  { %361 = vadd.xlane.f32.xlu1 %v360_v17 }
 0x132   :  { %428 = vadd.xlane.f32.xlu0 %v427_v38 }
 0x134   :  { %431 = vadd.xlane.f32.xlu1 %v430_v37 }
 0x136   :  { %458 = vadd.xlane.f32.xlu0 %v457_v36 }
 0x138   :  { %461 = vadd.xlane.f32.xlu1 %v460_v35 }
 0x177   :  { %v305_v10 = vpop.xlane.xlu0 %304 }
 0x178   :  { %v1543_v33 = vmul.f32 0.0051020407, %v305_v10 }
 0x179   :  { %v338_v12 = vpop.xlane.xlu1 %337 }
 0x17a   :  { %v1541_v27 = vmul.f32 0.0051020407, %v338_v12  ;;  %v503_v60 = vmul.f32 %v1543_v33, %v1543_v33 }
 0x17b   :  { %v335_v23 = vpop.xlane.xlu0 %334 }
 0x17c   :  { %v514_v48 = vmul.f32 %v1541_v27, %v1541_v27  ;;  %v1551_v37 = vmul.f32 0.0051020407, %v335_v23 }
 0x17d   :  { %v408_v24 = vpop.xlane.xlu1 %407 }
 0x17e   :  { %v484_v59 = vmul.f32 0.0051020407, %v408_v24  ;;  %v513_v18 = vmul.f32 %v1551_v37, %v1551_v37 }
 0x17f   :  { %v308_v29 = vpop.xlane.xlu0 %307 }
 0x180   :  { %v1545_v34 = vmul.f32 0.0051020407, %v308_v29 }
 0x181   :  { %v438_v42 = vpop.xlane.xlu1 %437 }
 0x182   :  { %v504_v36 = vmul.f32 %v1545_v34, %v1545_v34  ;;  %v494_v35 = vmul.f32 0.0051020407, %v438_v42 }
 0x183   :  { %v405_v38 = vpop.xlane.xlu0 %404 }
 0x184   :  { %v524_v62 = vsub.f32 %v484_v59, %v504_v36  ;;  %v534_v7 = vsub.f32 %v494_v35, %v514_v48  ;;  %v483_v13 = vmul.f32 0.0051020407, %v405_v38  ;;  %v544_v38 = vld [vmem:[%s2046_s2 + $0x8] sm:$0xff] }
 0x185   :  { %v311_v14 = vpop.xlane.xlu1 %310 }
 0x186   :  { %v564_v17 = vadd.f32 1e-05, %v524_v62  ;;  %v523_v61 = vsub.f32 %v483_v13, %v503_v60  ;;  %v574_v30 = vadd.f32 1e-05, %v534_v7  ;;  %v1557_v57 = vmul.f32 0.0051020407, %v311_v14 }
 0x187   :  { %v435_v28 = vpop.xlane.xlu0 %434  ;;  %v543_v62 = vld [vmem:[%s2046_s2] sm:$0xff] }
 0x188   :  { %1188 = vrsqrt.f32 %v564_v17  ;;  %v563_v39 = vadd.f32 1e-05, %v523_v61  ;;  %v493_v63 = vmul.f32 0.0051020407, %v435_v28  ;;  %v505_v23 = vmul.f32 %v1557_v57, %v1557_v57 }
 0x189   :  { %v314_v49 = vpop.xlane.xlu1 %313 }
 0x18a   :  { %1190 = vrsqrt.f32 %v563_v39  ;;  %v533_v52 = vsub.f32 %v493_v63, %v513_v18  ;;  %v1559_v10 = vmul.f32 0.0051020407, %v314_v49 }
 0x18b   :  { %v341_v2 = vpop.xlane.xlu0 %340  ;;  %1192 = vrsqrt.f32 %v574_v30 }
 0x18c   :  { %v573_v8 = vadd.f32 1e-05, %v533_v52  ;;  %v506_v29 = vmul.f32 %v1559_v10, %v1559_v10  ;;  %v1565_v42 = vmul.f32 0.0051020407, %v341_v2 }
 0x18d   :  { %v344_v12 = vpop.xlane.xlu1 %343 }
 0x18e   :  { %1194 = vrsqrt.f32 %v573_v8  ;;  %v1567_v48 = vmul.f32 0.0051020407, %v344_v12  ;;  %v515_v17 = vmul.f32 %v1565_v42, %v1565_v42  ;;  %v554_v8 = vld [vmem:[%s2046_s2 + $0x58] sm:$0xff]  ;;  %v553_v12 = vld [vmem:[%s2046_s2 + $0x50] sm:$0xff] }
 0x18f   :  { %v411_v24 = vpop.xlane.xlu0 %410 }
 0x190   :  { %v485_v59 = vmul.f32 0.0051020407, %v411_v24  ;;  %v516_v61 = vmul.f32 %v1567_v48, %v1567_v48 }
 0x191   :  { %v414_v36 = vpop.xlane.xlu1 %413 }
 0x192   :  { %v1189_v35 = vpop.eup %1188  ;;  %v486_v60 = vmul.f32 0.0051020407, %v414_v36  ;;  %v525_v7 = vsub.f32 %v485_v59, %v505_v23 }
 0x193   :  { %v441_v13 = vpop.xlane.xlu0 %440  ;;  %v604_v30 = vmul.f32 %v1189_v35, %v544_v38 }
 0x194   :  { %v1191_v14 = vpop.eup %1190  ;;  %v526_v18 = vsub.f32 %v486_v60, %v506_v29  ;;  %v495_v28 = vmul.f32 0.0051020407, %v441_v13  ;;  %v565_v23 = vadd.f32 1e-05, %v525_v7 }
 0x195   :  { %v444_v39 = vpop.xlane.xlu1 %443  ;;  %v603_v63 = vmul.f32 %v1191_v14, %v543_v62  ;;  %v1193_v49 = vpop.eup %1192  ;;  %v644_v35 = vmul.f32 %v604_v30, %v1545_v34  ;;  %v624_v14 = vld [vmem:[%s2047_s3 + $0x8] sm:$0xff] }
 0x196   :  { %v566_v52 = vadd.f32 1e-05, %v526_v18  ;;  %v496_v2 = vmul.f32 0.0051020407, %v444_v39  ;;  %v535_v29 = vsub.f32 %v495_v28, %v515_v17  ;;  %v614_v60 = vmul.f32 %v1193_v49, %v554_v8  ;;  %v634_v49 = vld [vmem:[%s2047_s3 + $0x58] sm:$0xff] }
 0x197   :  { %v317_v24 = vpop.xlane.xlu0 %316  ;;  %685 = vperm.xlu0 %1164, %v603_v63   ;;  %v643_v28 = vmul.f32 %v603_v63, %v1543_v33  ;;  %v546_v33 = vld [vmem:[%s2046_s2 + $0x18] sm:$0xff] }
 0x198   :  { %v1195_v59 = vpop.eup %1194  ;;  %1196 = vrsqrt.f32 %v566_v52  ;;  %v536_v36 = vsub.f32 %v496_v2, %v516_v61  ;;  %v575_v7 = vadd.f32 1e-05, %v535_v29  ;;  %v664_v61 = vsub.f32 %v624_v14, %v644_v35  ;;  %v623_v52 = vld [vmem:[%s2047_s3] sm:$0xff] }
 0x199   :  { %v320_v38 = vpop.xlane.xlu1 %319  ;;  %v613_v62 = vmul.f32 %v1195_v59, %v553_v12  ;;  %1198 = vrsqrt.f32 %v565_v23  ;;  %v654_v34 = vmul.f32 %v614_v60, %v1541_v27  ;;  %v1599_v8 = vmul.f32 0.0051020407, %v317_v24 }
 0x19a   :  { %v576_v13 = vadd.f32 1e-05, %v536_v36  ;;  %v1589_v39 = vmul.f32 0.0051020407, %v320_v38  ;;  %v663_v59 = vsub.f32 %v623_v52, %v643_v28  ;;  %v545_v52 = vld [vmem:[%s2046_s2 + $0x10] sm:$0xff] }
 0x19b   :  { %v347_v18 = vpop.xlane.xlu0 %346  ;;  %740 = vperm.xlu0 %1164, %v614_v60   ;;  %735 = vperm.xlu1 %1165, %v613_v62   ;;  %v674_v23 = vsub.f32 %v634_v49, %v654_v34  ;;  %v653_v29 = vmul.f32 %v613_v62, %v1551_v37  ;;  %v556_v62 = vld [vmem:[%s2046_s2 + $0x68] sm:$0xff] }
 0x19c   :  { %1200 = vrsqrt.f32 %v576_v13  ;;  %v508_v12 = vmul.f32 %v1589_v39, %v1589_v39  ;;  %v1612_v24 = vmul.f32 0.0051020407, %v347_v18  ;;  %v507_v13 = vmul.f32 %v1599_v8, %v1599_v8 }
 0x19d   :  { %v350_v17 = vpop.xlane.xlu1 %349  ;;  %1202 = vrsqrt.f32 %v575_v7 }
 0x19e   :  { %v1603_v27 = vmul.f32 0.0051020407, %v350_v17 }
 0x19f   :  { %v417_v2 = vpop.xlane.xlu0 %416  ;;  %830 = vperm.xlu0 %1164, %v664_v61   ;;  %690 = vperm.xlu1 %1165, %v604_v30   ;;  %v633_v30 = vld [vmem:[%s2047_s3 + $0x50] sm:$0xff] }
 0x1a0   :  { %v518_v14 = vmul.f32 %v1603_v27, %v1603_v27  ;;  %v487_v7 = vmul.f32 0.0051020407, %v417_v2  ;;  %v673_v18 = vsub.f32 %v633_v30, %v653_v29  ;;  %v626_v29 = vld [vmem:[%s2047_s3 + $0x18] sm:$0xff] }
 0x1a1   :  { %v420_v63 = vpop.xlane.xlu1 %419 }
 0x1a2   :  { %v1197_v36 = vpop.eup %1196  ;;  %v488_v35 = vmul.f32 0.0051020407, %v420_v63 }
 0x1a3   :  { %v447_v38 = vpop.xlane.xlu0 %446  ;;  %880 = vperm.xlu0 %1164, %v674_v23   ;;  %825 = vperm.xlu1 %1165, %v663_v59   ;;  %v606_v60 = vmul.f32 %v1197_v36, %v546_v33  ;;  %v1199_v17 = vpop.eup %1198  ;;  %v517_v33 = vmul.f32 %v1612_v24, %v1612_v24  ;;  %v527_v23 = vsub.f32 %v487_v7, %v507_v13 }
 0x1a4   :  { %v528_v37 = vsub.f32 %v488_v35, %v508_v12  ;;  %v497_v59 = vmul.f32 0.0051020407, %v447_v38  ;;  %v605_v30 = vmul.f32 %v1199_v17, %v545_v52  ;;  %v636_v17 = vld [vmem:[%s2047_s3 + $0x68] sm:$0xff] }
 0x1a5   :  { %v450_v61 = vpop.xlane.xlu1 %449  ;;  %v646_v12 = vmul.f32 %v606_v60, %v1559_v10  ;;  %v567_v38 = vadd.f32 1e-05, %v527_v23 }
 0x1a6   :  { %v1201_v34 = vpop.eup %1200  ;;  %v568_v28 = vadd.f32 1e-05, %v528_v37  ;;  %v498_v49 = vmul.f32 0.0051020407, %v450_v61  ;;  %v645_v23 = vmul.f32 %v605_v30, %v1557_v57  ;;  %v558_v57 = vld [vmem:[%s2046_s2 + $0x78] sm:$0xff] }
 0x1a7   :  { %v323_v63 = vpop.xlane.xlu0 %322  ;;  %875 = vperm.xlu1 %1165, %v673_v18   ;;  %v616_v2 = vmul.f32 %v1201_v34, %v556_v62  ;;  %v1203_v37 = vpop.eup %1202  ;;  %v555_v18 = vld [vmem:[%s2046_s2 + $0x60] sm:$0xff]  ;;  %v666_v10 = vsub.f32 %v626_v29, %v646_v12 }
 0x1a8   :  { %1204 = vrsqrt.f32 %v568_v28  ;;  %v538_v36 = vsub.f32 %v498_v49, %v518_v14  ;;  %v537_v14 = vsub.f32 %v497_v59, %v517_v33  ;;  %v615_v28 = vmul.f32 %v1203_v37, %v555_v18  ;;  %v548_v33 = vld [vmem:[%s2046_s2 + $0x28] sm:$0xff] }
 0x1a9   :  { %v326_v35 = vpop.xlane.xlu1 %325  ;;  %750 = vperm.xlu0 %1164, %v616_v2   ;;  %v656_v13 = vmul.f32 %v616_v2, %v1567_v48 }
 0x1aa   :  { %v578_v61 = vadd.f32 1e-05, %v538_v36  ;;  %v1634_v7 = vmul.f32 0.0051020407, %v326_v35  ;;  %v577_v36 = vadd.f32 1e-05, %v537_v14  ;;  %v655_v14 = vmul.f32 %v615_v28, %v1565_v42 }
 0x1ab   :  { %v353_v62 = vpop.xlane.xlu0 %352  ;;  %695 = vperm.xlu1 %1165, %v605_v30   ;;  %v676_v52 = vsub.f32 %v636_v17, %v656_v13  ;;  %v625_v35 = vld [vmem:[%s2047_s3 + $0x10] sm:$0xff] }
 0x1ac   :  { %1206 = vrsqrt.f32 %v578_v61  ;;  %v510_v48 = vmul.f32 %v1634_v7, %v1634_v7  ;;  %v1652_v61 = vmul.f32 0.0051020407, %v323_v63  ;;  %v635_v63 = vld [vmem:[%s2047_s3 + $0x60] sm:$0xff] }
 0x1ad   :  { %v356_v34 = vpop.xlane.xlu1 %355  ;;  %840 = vperm.xlu0 %1164, %v666_v10   ;;  %1208 = vrsqrt.f32 %v567_v38  ;;  %v665_v38 = vsub.f32 %v625_v35, %v645_v23  ;;  %v547_v35 = vld [vmem:[%s2046_s2 + $0x20] sm:$0xff] }
 0x1ae   :  { %v1641_v2 = vmul.f32 0.0051020407, %v356_v34  ;;  %1210 = vrsqrt.f32 %v577_v36 }
 0x1af   :  { %v423_v49 = vpop.xlane.xlu0 %422  ;;  %745 = vperm.xlu1 %1165, %v615_v28   ;;  %v628_v28 = vld [vmem:[%s2047_s3 + $0x28] sm:$0xff] }
 0x1b0   :  { %v520_v18 = vmul.f32 %v1641_v2, %v1641_v2 }
 0x1b1   :  { %v426_v12 = vpop.xlane.xlu1 %425  ;;  %890 = vperm.xlu0 %1164, %v676_v52   ;;  %v1663_v52 = vmul.f32 0.0051020407, %v353_v62 }
 0x1b2   :  { %v1205_v59 = vpop.eup %1204  ;;  %v490_v29 = vmul.f32 0.0051020407, %v426_v12  ;;  %v489_v12 = vmul.f32 0.0051020407, %v423_v49 }
 0x1b3   :  { %700 = vperm.xlu1 %1165, %v606_v60   ;;  %v1650_v37 = vmul.f32 %v1205_v59, %v548_v33  ;;  %v453_v30 = vpop.xlane.xlu0 %452  ;;  %v509_v33 = vmul.f32 %v1652_v61, %v1652_v61  ;;  %v675_v59 = vsub.f32 %v635_v63, %v655_v14  ;;  %v638_v14 = vld [vmem:[%s2047_s3 + $0x78] sm:$0xff] }
 0x1b4   :  { %v530_v10 = vsub.f32 %v490_v29, %v510_v48 }
 0x1b5   :  { %v456_v13 = vpop.xlane.xlu1 %455  ;;  %v648_v48 = vmul.f32 %v1650_v37, %v1589_v39  ;;  %v519_v39 = vmul.f32 %v1663_v52, %v1663_v52 }
 0x1b6   :  { %v1207_v17 = vpop.eup %1206  ;;  %v570_v60 = vadd.f32 1e-05, %v530_v10  ;;  %v500_v34 = vmul.f32 0.0051020407, %v456_v13  ;;  %v499_v10 = vmul.f32 0.0051020407, %v453_v30  ;;  %v529_v13 = vsub.f32 %v489_v12, %v509_v33 }
 0x1b7   :  { %835 = vperm.xlu1 %1165, %v665_v38   ;;  %v618_v36 = vmul.f32 %v1207_v17, %v558_v57  ;;  %v1209_v62 = vpop.eup %1208  ;;  %v329_v49 = vpop.xlane.xlu0 %328  ;;  %v557_v30 = vld [vmem:[%s2046_s2 + $0x70] sm:$0xff]  ;;  %v550_v12 = vld [vmem:[%s2046_s2 + $0x38] sm:$0xff] }
 0x1b8   :  { %1212 = vrsqrt.f32 %v570_v60  ;;  %v540_v42 = vsub.f32 %v500_v34, %v520_v18  ;;  %v668_v18 = vsub.f32 %v628_v28, %v648_v48  ;;  %v607_v60 = vmul.f32 %v1209_v62, %v547_v35  ;;  %v1211_v34 = vpop.eup %1210 }
 0x1b9   :  { %760 = vperm.xlu0 %1164, %v618_v36   ;;  %v332_v23 = vpop.xlane.xlu1 %331  ;;  %v658_v57 = vmul.f32 %v618_v36, %v1603_v27  ;;  %v539_v63 = vsub.f32 %v499_v10, %v519_v39  ;;  %v569_v27 = vadd.f32 1e-05, %v529_v13 }
 0x1ba   :  { %v580_v29 = vadd.f32 1e-05, %v540_v42  ;;  %v1678_v38 = vmul.f32 0.0051020407, %v332_v23  ;;  %v617_v23 = vmul.f32 %v1211_v34, %v557_v30  ;;  %v647_v13 = vmul.f32 %v607_v60, %v1599_v8  ;;  %v627_v30 = vld [vmem:[%s2047_s3 + $0x20] sm:$0xff]  ;;  %v630_v8 = vld [vmem:[%s2047_s3 + $0x38] sm:$0xff] }
 0x1bb   :  { %885 = vperm.xlu1 %1165, %v675_v59   ;;  %v678_v48 = vsub.f32 %v638_v14, %v658_v57  ;;  %v359_v42 = vpop.xlane.xlu0 %358 }
 0x1bc   :  { %1214 = vrsqrt.f32 %v580_v29  ;;  %v512_v36 = vmul.f32 %v1678_v38, %v1678_v38  ;;  %v579_v29 = vadd.f32 1e-05, %v539_v63 }
 0x1bd   :  { %850 = vperm.xlu0 %1164, %v668_v18   ;;  %v362_v17 = vpop.xlane.xlu1 %361  ;;  %1216 = vrsqrt.f32 %v569_v27  ;;  %v560_v18 = vld [vmem:[%s2046_s2 + $0x88] sm:$0xff] }
 0x1be   :  { %v1688_v33 = vmul.f32 0.0051020407, %v362_v17  ;;  %1218 = vrsqrt.f32 %v579_v29  ;;  %v481_v29 = vmul.f32 0.0051020407, %v359_v42  ;;  %v552_v42 = vld [vmem:[%s2046_s2 + $0x48] sm:$0xff] }
 0x1bf   :  { %705 = vperm.xlu1 %1165, %v607_v60   ;;  %v429_v63 = vpop.xlane.xlu0 %428  ;;  %v667_v60 = vsub.f32 %v627_v30, %v647_v13 }
 0x1c0   :  { %v522_v39 = vmul.f32 %v1688_v33, %v1688_v33  ;;  %v521_v13 = vmul.f32 %v481_v29, %v481_v29 }
 0x1c1   :  { %900 = vperm.xlu0 %1164, %v678_v48   ;;  %v432_v28 = vpop.xlane.xlu1 %431 }
 0x1c2   :  { %v1213_v59 = vpop.eup %1212  ;;  %v492_v62 = vmul.f32 0.0051020407, %v432_v28  ;;  %v657_v28 = vmul.f32 %v617_v23, %v1612_v24 }
 0x1c3   :  { %755 = vperm.xlu1 %1165, %v617_v23   ;;  %v1693_v35 = vmul.f32 %v1213_v59, %v550_v12  ;;  %v459_v24 = vpop.xlane.xlu0 %458 }
 0x1c4   :  { %v532_v10 = vsub.f32 %v492_v62, %v512_v36  ;;  %v1707_v36 = vmul.f32 0.0051020407, %v329_v49 }
 0x1c5   :  { %v462_v57 = vpop.xlane.xlu1 %461  ;;  %v650_v27 = vmul.f32 %v1693_v35, %v1634_v7 }
 0x1c6   :  { %v1215_v14 = vpop.eup %1214  ;;  %v572_v17 = vadd.f32 1e-05, %v532_v10  ;;  %v502_v34 = vmul.f32 0.0051020407, %v462_v57  ;;  %v511_v49 = vmul.f32 %v1707_v36, %v1707_v36  ;;  %v640_v10 = vld [vmem:[%s2047_s3 + $0x88] sm:$0xff]  ;;  %v549_v57 = vld [vmem:[%s2046_s2 + $0x30] sm:$0xff] }
 0x1c7   :  { %710 = vperm.xlu1 %1165, %v1650_v37   ;;  %v620_v48 = vmul.f32 %v1215_v14, %v560_v18  ;;  %v637_v37 = vld [vmem:[%s2047_s3 + $0x70] sm:$0xff]  ;;  %v670_v62 = vsub.f32 %v630_v8, %v650_v27  ;;  %v1217_v18 = vpop.eup %1216 }
 0x1c8   :  { %1220 = vrsqrt.f32 %v572_v17  ;;  %v542_v12 = vsub.f32 %v502_v34, %v522_v39  ;;  %v491_v39 = vmul.f32 0.0051020407, %v429_v63  ;;  %v677_v23 = vsub.f32 %v637_v37, %v657_v28  ;;  %v1219_v34 = vpop.eup %1218 }
 0x1c9   :  { %770 = vperm.xlu0 %1164, %v620_v48   ;;  %v660_v7 = vmul.f32 %v620_v48, %v1641_v2  ;;  %v501_v17 = vmul.f32 0.0051020407, %v459_v24  ;;  %v609_v30 = vmul.f32 %v1217_v18, %v549_v57  ;;  %v559_v48 = vld [vmem:[%s2046_s2 + $0x80] sm:$0xff] }
 0x1ca   :  { %v582_v59 = vadd.f32 1e-05, %v542_v12  ;;  %v531_v14 = vsub.f32 %v491_v39, %v511_v49  ;;  %v619_v28 = vmul.f32 %v1219_v34, %v559_v48  ;;  %v632_v49 = vld [vmem:[%s2047_s3 + $0x48] sm:$0xff] }
 0x1cb   :  { %845 = vperm.xlu1 %1165, %v667_v60   ;;  %v680_v2 = vsub.f32 %v640_v10, %v660_v7  ;;  %v541_v8 = vsub.f32 %v501_v17, %v521_v13  ;;  %v562_v60 = vld [vmem:[%s2046_s2 + $0x98] sm:$0xff]  ;;  %v649_v39 = vmul.f32 %v609_v30, %v1652_v61  ;;  %v629_v10 = vld [vmem:[%s2047_s3 + $0x30] sm:$0xff]  ;;  %v639_v61 = vld [vmem:[%s2047_s3 + $0x80] sm:$0xff] }
 0x1cc   :  { %1222 = vrsqrt.f32 %v582_v59  ;;  %v571_v12 = vadd.f32 1e-05, %v531_v14  ;;  %v659_v57 = vmul.f32 %v619_v28, %v1663_v52  ;;  %v561_v52 = vld [vmem:[%s2046_s2 + $0x90] sm:$0xff] }
 0x1cd   :  { %860 = vperm.xlu0 %1164, %v670_v62   ;;  %v581_v7 = vadd.f32 1e-05, %v541_v8  ;;  %v669_v18 = vsub.f32 %v629_v10, %v649_v39 }
 0x1ce   :  { %1224 = vrsqrt.f32 %v571_v12 }
 0x1cf   :  { %895 = vperm.xlu1 %1165, %v677_v23   ;;  %1226 = vrsqrt.f32 %v581_v7  ;;  %v966_v7 = vld [vmem:[%s2048_s4 + $0x18] sm:$0xff] }
 0x1d1   :  { %910 = vperm.xlu0 %1164, %v680_v2  }
 0x1d2   :  { %v1221_v63 = vpop.eup %1220 }
 0x1d3   :  { %715 = vperm.xlu1 %1165, %v609_v30   ;;  %v612_v27 = vmul.f32 %v1221_v63, %v552_v42  ;;  %v631_v30 = vld [vmem:[%s2047_s3 + $0x40] sm:$0xff] }
 0x1d5   :  { %730 = vperm.xlu0 %1164, %v612_v27   ;;  %v652_v62 = vmul.f32 %v612_v27, %v1678_v38  ;;  %v642_v38 = vld [vmem:[%s2047_s3 + $0x98] sm:$0xff]  ;;  %v641_v27 = vld [vmem:[%s2047_s3 + $0x90] sm:$0xff] }
 0x1d6   :  { %v1223_v59 = vpop.eup %1222 }
 0x1d7   :  { %765 = vperm.xlu1 %1165, %v619_v28   ;;  %v622_v37 = vmul.f32 %v1223_v59, %v562_v60  ;;  %v672_v24 = vsub.f32 %v632_v49, %v652_v62 }
 0x1d8   :  { %v1225_v13 = vpop.eup %1224 }
 0x1d9   :  { %780 = vperm.xlu0 %1164, %v622_v37   ;;  %v662_v23 = vmul.f32 %v622_v37, %v1688_v33  ;;  %v551_v33 = vld [vmem:[%s2046_s2 + $0x40] sm:$0xff]  ;;  %v1227_v17 = vpop.eup %1226 }
 0x1da   :  { %v611_v14 = vmul.f32 %v1225_v13, %v551_v33  ;;  %v621_v42 = vmul.f32 %v1227_v17, %v561_v52 }
 0x1db   :  { %720 = vperm.xlu1 %1165, %v1693_v35   ;;  %v682_v2 = vsub.f32 %v642_v38, %v662_v23  ;;  %v679_v35 = vsub.f32 %v639_v61, %v659_v57  ;;  %v986_v38 = vld [vmem:[%s2048_s4 + $0xb8] sm:$0xff] }
 0x1dc   :  { %v651_v34 = vmul.f32 %v611_v14, %v1707_v36  ;;  %v661_v48 = vmul.f32 %v621_v42, %v481_v29  ;;  %v965_v29 = vld [vmem:[%s2048_s4 + $0x10] sm:$0xff] }
 0x1dd   :  { %870 = vperm.xlu0 %1164, %v672_v24  }
 0x1de   :  { %v671_v63 = vsub.f32 %v631_v30, %v651_v34  ;;  %v681_v12 = vsub.f32 %v641_v27, %v661_v48  ;;  %v983_v48 = vld [vmem:[%s2048_s4 + $0xa0] sm:$0xff]  ;;  %v984_v27 = vld [vmem:[%s2048_s4 + $0xa8] sm:$0xff] }
 0x1df   :  { %855 = vperm.xlu1 %1165, %v669_v18  }
 0x1e1   :  { %920 = vperm.xlu0 %1164, %v682_v2  }
 0x1e3   :  { %905 = vperm.xlu1 %1165, %v679_v35  }
 0x1e7   :  { %725 = vperm.xlu1 %1165, %v611_v14  }
 0x1eb   :  { %775 = vperm.xlu1 %1165, %v621_v42  }
 0x1ef   :  { %865 = vperm.xlu1 %1165, %v671_v63  }
 0x1f3   :  { %915 = vperm.xlu1 %1165, %v681_v12  }
 0x216   :  { %v686_v8 = vpop.permute.xlu0 %685 }
 0x217   :  { %v783_v23 = vmul.f32 %v686_v8, %v1323_v19  ;;  %v963_v19 = vld [vmem:[%s2048_s4] sm:$0xff] }
 0x21a   :  { %v741_v60 = vpop.permute.xlu0 %740  ;;  %v736_v28 = vpop.permute.xlu1 %735 }
 0x21b   :  { %v805_v49 = vmul.f32 %v741_v60, %v1337_v26  ;;  %v806_v39 = vmul.f32 %v741_v60, %v1349_v32  ;;  %v803_v35 = vmul.f32 %v736_v28, %v1325_v20  ;;  %v804_v13 = vmul.f32 %v736_v28, %v1329_v22 }
 0x21e   :  { %v831_v59 = vpop.permute.xlu0 %830  ;;  %v691_v37 = vpop.permute.xlu1 %690 }
 0x21f   :  { %v785_v36 = vmul.f32 %v691_v37, %v1335_v25  ;;  %v786_v62 = vmul.f32 %v691_v37, %v1347_v31  ;;  %v784_v25 = vmul.f32 %v686_v8, %v1327_v21  ;;  %v985_v31 = vld [vmem:[%s2048_s4 + $0xb0] sm:$0xff]  ;;  %v964_v21 = vld [vmem:[%s2048_s4 + $0x8] sm:$0xff] }
 0x221   :  { %v925_v10 = vadd.f32 %v831_v59, %v785_v36  ;;  %v926_v24 = vadd.f32 %v831_v59, %v786_v62 }
 0x222   :  { %v881_v18 = vpop.permute.xlu0 %880  ;;  %v826_v57 = vpop.permute.xlu1 %825 }
 0x223   :  { %v1005_v61 = vadd.f32 %v965_v29, %v925_v10  ;;  %v1006_v26 = vadd.f32 %v966_v7, %v926_v24  ;;  %v945_v2 = vadd.f32 %v881_v18, %v805_v49  ;;  %v946_v32 = vadd.f32 %v881_v18, %v806_v39 }
 0x224   :  { %v923_v33 = vadd.f32 %v826_v57, %v783_v23  ;;  %v924_v14 = vadd.f32 %v826_v57, %v784_v25 }
 0x225   :  { %v1045_v17 = vmax.f32 %v1005_v61, 0.0  ;;  %v1046_v52 = vmax.f32 %v1006_v26, 0.0  ;;  %v1025_v42 = vadd.f32 %v985_v31, %v945_v2  ;;  %v1026_v34 = vadd.f32 %v986_v38, %v946_v32 }
 0x226   :  { %v1003_v30 = vadd.f32 %v963_v19, %v923_v33  ;;  %v1004_v63 = vadd.f32 %v964_v21, %v924_v14  ;;  %v876_v12 = vpop.permute.xlu1 %875 }
 0x227   :  { %1085 = vst [vmem:[%s2049_s5 + $0x10] sm:$0xff] %v1045_v17  ;;  %1086 = vst [vmem:[%s2049_s5 + $0x18] sm:$0xff] %v1046_v52  ;;  %v1065_v20 = vmax.f32 %v1025_v42, 0.0  ;;  %v1066_v22 = vmax.f32 %v1026_v34, 0.0  ;;  %v943_v8 = vadd.f32 %v876_v12, %v803_v35  ;;  %v944_v60 = vadd.f32 %v876_v12, %v804_v13 }
 0x228   :  { %v1043_v28 = vmax.f32 %v1003_v30, 0.0  ;;  %v1044_v59 = vmax.f32 %v1004_v63, 0.0  ;;  %v751_v37 = vpop.permute.xlu0 %750 }
 0x229   :  { %1105 = vst [vmem:[%s2049_s5 + $0xb0] sm:$0xff] %v1065_v20  ;;  %1106 = vst [vmem:[%s2049_s5 + $0xb8] sm:$0xff] %v1066_v22  ;;  %v1023_v36 = vadd.f32 %v983_v48, %v943_v8  ;;  %v1024_v62 = vadd.f32 %v984_v27, %v944_v60  ;;  %v809_v24 = vmul.f32 %v751_v37, %v1379_v51 }
 0x22a   :  { %1083 = vst [vmem:[%s2049_s5] sm:$0xff] %v1043_v28  ;;  %1084 = vst [vmem:[%s2049_s5 + $0x8] sm:$0xff] %v1044_v59  ;;  %v696_v29 = vpop.permute.xlu1 %695  ;;  %v810_v23 = vmul.f32 %v751_v37, %v1389_v56 }
 0x22b   :  { %v1063_v7 = vmax.f32 %v1023_v36, 0.0  ;;  %v1064_v49 = vmax.f32 %v1024_v62, 0.0  ;;  %v787_v56 = vmul.f32 %v696_v29, %v1363_v43  ;;  %v788_v19 = vmul.f32 %v696_v29, %v1367_v45 }
 0x22c   :  { %v841_v39 = vpop.permute.xlu0 %840 }
 0x22d   :  { %1103 = vst [vmem:[%s2049_s5 + $0xa0] sm:$0xff] %v1063_v7  ;;  %1104 = vst [vmem:[%s2049_s5 + $0xa8] sm:$0xff] %v1064_v49 }
 0x22e   :  { %v746_v10 = vpop.permute.xlu1 %745 }
 0x22f   :  { %v807_v30 = vmul.f32 %v746_v10, %v1365_v44  ;;  %v808_v63 = vmul.f32 %v746_v10, %v1369_v46 }
 0x230   :  { %v891_v38 = vpop.permute.xlu0 %890 }
 0x231   :  { %v949_v18 = vadd.f32 %v891_v38, %v809_v24  ;;  %v950_v57 = vadd.f32 %v891_v38, %v810_v23 }
 0x232   :  { %v701_v61 = vpop.permute.xlu1 %700 }
 0x233   :  { %v789_v32 = vmul.f32 %v701_v61, %v1377_v50  ;;  %v790_v51 = vmul.f32 %v701_v61, %v1387_v55 }
 0x234   :  { %v989_v25 = vld [vmem:[%s2048_s4 + $0xd0] sm:$0xff]  ;;  %v990_v31 = vld [vmem:[%s2048_s4 + $0xd8] sm:$0xff]  ;;  %v967_v50 = vld [vmem:[%s2048_s4 + $0x20] sm:$0xff] }
 0x235   :  { %v1029_v26 = vadd.f32 %v989_v25, %v949_v18  ;;  %v1030_v2 = vadd.f32 %v990_v31, %v950_v57  ;;  %v969_v21 = vld [vmem:[%s2048_s4 + $0x30] sm:$0xff]  ;;  %v970_v35 = vld [vmem:[%s2048_s4 + $0x38] sm:$0xff]  ;;  %v929_v14 = vadd.f32 %v841_v39, %v789_v32  ;;  %v930_v17 = vadd.f32 %v841_v39, %v790_v51  ;;  %v968_v43 = vld [vmem:[%s2048_s4 + $0x28] sm:$0xff] }
 0x236   :  { %v836_v45 = vpop.permute.xlu1 %835 }
 0x237   :  { %v1069_v13 = vmax.f32 %v1029_v26, 0.0  ;;  %v1070_v33 = vmax.f32 %v1030_v2, 0.0  ;;  %v1009_v55 = vadd.f32 %v969_v21, %v929_v14  ;;  %v1010_v52 = vadd.f32 %v970_v35, %v930_v17 }
 0x238   :  { %v927_v42 = vadd.f32 %v836_v45, %v787_v56  ;;  %v928_v34 = vadd.f32 %v836_v45, %v788_v19  ;;  %v761_v48 = vpop.permute.xlu0 %760 }
 0x239   :  { %1109 = vst [vmem:[%s2049_s5 + $0xd0] sm:$0xff] %v1069_v13  ;;  %1110 = vst [vmem:[%s2049_s5 + $0xd8] sm:$0xff] %v1070_v33  ;;  %v1049_v27 = vmax.f32 %v1009_v55, 0.0  ;;  %v1050_v12 = vmax.f32 %v1010_v52, 0.0  ;;  %v813_v49 = vmul.f32 %v761_v48, %v1423_v11  ;;  %v814_v39 = vmul.f32 %v761_v48, %v1435_v16 }
 0x23a   :  { %v1007_v20 = vadd.f32 %v967_v50, %v927_v42  ;;  %v1008_v22 = vadd.f32 %v968_v43, %v928_v34  ;;  %v886_v28 = vpop.permute.xlu1 %885 }
 0x23b   :  { %v947_v59 = vadd.f32 %v886_v28, %v807_v30  ;;  %v948_v37 = vadd.f32 %v886_v28, %v808_v63 }
 0x23c   :  { %v1047_v44 = vmax.f32 %v1007_v20, 0.0  ;;  %v1048_v46 = vmax.f32 %v1008_v22, 0.0  ;;  %v851_v36 = vpop.permute.xlu0 %850 }
 0x23e   :  { %v706_v7 = vpop.permute.xlu1 %705 }
 0x23f   :  { %v791_v35 = vmul.f32 %v706_v7, %v1405_v3  ;;  %v792_v13 = vmul.f32 %v706_v7, %v1409_v5 }
 0x240   :  { %v987_v8 = vld [vmem:[%s2048_s4 + $0xc0] sm:$0xff]  ;;  %v988_v60 = vld [vmem:[%s2048_s4 + $0xc8] sm:$0xff]  ;;  %v901_v31 = vpop.permute.xlu0 %900 }
 0x241   :  { %1089 = vst [vmem:[%s2049_s5 + $0x30] sm:$0xff] %v1049_v27  ;;  %1090 = vst [vmem:[%s2049_s5 + $0x38] sm:$0xff] %v1050_v12  ;;  %v1027_v62 = vadd.f32 %v987_v8, %v947_v59  ;;  %v1028_v29 = vadd.f32 %v988_v60, %v948_v37  ;;  %v953_v11 = vadd.f32 %v901_v31, %v813_v49 }
 0x242   :  { %1087 = vst [vmem:[%s2049_s5 + $0x20] sm:$0xff] %v1047_v44  ;;  %1088 = vst [vmem:[%s2049_s5 + $0x28] sm:$0xff] %v1048_v46  ;;  %v954_v16 = vadd.f32 %v901_v31, %v814_v39  ;;  %v756_v38 = vpop.permute.xlu1 %755 }
 0x243   :  { %v1067_v10 = vmax.f32 %v1027_v62, 0.0  ;;  %v1068_v24 = vmax.f32 %v1028_v29, 0.0  ;;  %v811_v52 = vmul.f32 %v756_v38, %v1407_v4  ;;  %v812_v3 = vmul.f32 %v756_v38, %v1411_v6 }
 0x246   :  { %v711_v2 = vpop.permute.xlu1 %710 }
 0x247   :  { %v793_v32 = vmul.f32 %v711_v2, %v1417_v9  ;;  %v794_v51 = vmul.f32 %v711_v2, %v1433_v15 }
 0x248   :  { %v771_v21 = vpop.permute.xlu0 %770 }
 0x249   :  { %v993_v23 = vld [vmem:[%s2048_s4 + $0xf0] sm:$0xff]  ;;  %v994_v25 = vld [vmem:[%s2048_s4 + $0xf8] sm:$0xff]  ;;  %v933_v33 = vadd.f32 %v851_v36, %v793_v32  ;;  %v934_v14 = vadd.f32 %v851_v36, %v794_v51  ;;  %v817_v48 = vmul.f32 %v771_v21, %v1471_v47  ;;  %v818_v27 = vmul.f32 %v771_v21, %v1481_v54 }
 0x24a   :  { %1107 = vst [vmem:[%s2049_s5 + $0xc0] sm:$0xff] %v1067_v10  ;;  %1108 = vst [vmem:[%s2049_s5 + $0xc8] sm:$0xff] %v1068_v24  ;;  %v1033_v18 = vadd.f32 %v993_v23, %v953_v11  ;;  %v1034_v57 = vadd.f32 %v994_v25, %v954_v16  ;;  %v846_v17 = vpop.permute.xlu1 %845 }
 0x24b   :  { %v931_v45 = vadd.f32 %v846_v17, %v791_v35  ;;  %v932_v55 = vadd.f32 %v846_v17, %v792_v13  ;;  %v2068_v35 = vld [vmem:[#allocation3_spill] sm:$0xff] }
 0x24c   :  { %v1073_v61 = vmax.f32 %v1033_v18, 0.0  ;;  %v1074_v26 = vmax.f32 %v1034_v57, 0.0  ;;  %v861_v5 = vpop.permute.xlu0 %860 }
 0x24e   :  { %1113 = vst [vmem:[%s2049_s5 + $0xf0] sm:$0xff] %v1073_v61  ;;  %1114 = vst [vmem:[%s2049_s5 + $0xf8] sm:$0xff] %v1074_v26  ;;  %v896_v4 = vpop.permute.xlu1 %895 }
 0x24f   :  { %v951_v54 = vadd.f32 %v896_v4, %v811_v52  ;;  %v952_v22 = vadd.f32 %v896_v4, %v812_v3 }
 0x250   :  { %v911_v28 = vpop.permute.xlu0 %910 }
 0x251   :  { %v957_v59 = vadd.f32 %v911_v28, %v817_v48  ;;  %v958_v37 = vadd.f32 %v911_v28, %v818_v27 }
 0x252   :  { %v716_v36 = vpop.permute.xlu1 %715 }
 0x254   :  { %v731_v39 = vpop.permute.xlu0 %730 }
 0x255   :  { %v973_v56 = vld [vmem:[%s2048_s4 + $0x50] sm:$0xff]  ;;  %v974_v19 = vld [vmem:[%s2048_s4 + $0x58] sm:$0xff]  ;;  %v971_v9 = vld [vmem:[%s2048_s4 + $0x40] sm:$0xff]  ;;  %v801_v11 = vmul.f32 %v731_v39, %v1508_v1  ;;  %v802_v16 = vmul.f32 %v731_v39, %v1520_v58 }
 0x256   :  { %v972_v15 = vld [vmem:[%s2048_s4 + $0x48] sm:$0xff]  ;;  %v1013_v50 = vadd.f32 %v973_v56, %v933_v33  ;;  %v1014_v43 = vadd.f32 %v974_v19, %v934_v14  ;;  %v1011_v30 = vadd.f32 %v971_v9, %v931_v45  ;;  %v991_v12 = vld [vmem:[%s2048_s4 + $0xe0] sm:$0xff]  ;;  %v766_v23 = vpop.permute.xlu1 %765  ;;  %v2069_v33 = vld [vmem:[#allocation5_spill] sm:$0xff] }
 0x257   :  { %v1012_v63 = vadd.f32 %v972_v15, %v932_v55  ;;  %v992_v20 = vld [vmem:[%s2048_s4 + $0xe8] sm:$0xff]  ;;  %v1031_v44 = vadd.f32 %v991_v12, %v951_v54  ;;  %v815_v13 = vmul.f32 %v766_v23, %v2068_v35  ;;  %v816_v14 = vmul.f32 %v766_v23, %v2069_v33 }
 0x258   :  { %v1053_v42 = vmax.f32 %v1013_v50, 0.0  ;;  %v1054_v34 = vmax.f32 %v1014_v43, 0.0  ;;  %v1051_v6 = vmax.f32 %v1011_v30, 0.0  ;;  %v1032_v46 = vadd.f32 %v992_v20, %v952_v22  ;;  %v781_v25 = vpop.permute.xlu0 %780 }
 0x259   :  { %v1052_v47 = vmax.f32 %v1012_v63, 0.0  ;;  %v1071_v62 = vmax.f32 %v1031_v44, 0.0  ;;  %v821_v52 = vmul.f32 %v781_v25, %v1512_v40  ;;  %v822_v3 = vmul.f32 %v781_v25, %v1522_v0  ;;  %v2071_v25 = vld [vmem:[#allocation8_spill] sm:$0xff] }
 0x25a   :  { %1093 = vst [vmem:[%s2049_s5 + $0x50] sm:$0xff] %v1053_v42  ;;  %1094 = vst [vmem:[%s2049_s5 + $0x58] sm:$0xff] %v1054_v34  ;;  %v1072_v29 = vmax.f32 %v1032_v46, 0.0  ;;  %v721_v31 = vpop.permute.xlu1 %720 }
 0x25b   :  { %v797_v18 = vmul.f32 %v721_v31, %v1467_v41  ;;  %v798_v57 = vmul.f32 %v721_v31, %v1479_v53  ;;  %v2066_v41 = vld [vmem:[#allocation2_spill] sm:$0xff]  ;;  %v2067_v53 = vld [vmem:[#allocation4_spill] sm:$0xff] }
 0x25c   :  { %v871_v58 = vpop.permute.xlu0 %870  ;;  %v795_v19 = vmul.f32 %v716_v36, %v2066_v41  ;;  %v796_v21 = vmul.f32 %v716_v36, %v2067_v53 }
 0x25d   :  { %v937_v2 = vadd.f32 %v861_v5, %v797_v18  ;;  %v938_v32 = vadd.f32 %v861_v5, %v798_v57  ;;  %v941_v51 = vadd.f32 %v871_v58, %v801_v11  ;;  %v942_v56 = vadd.f32 %v871_v58, %v802_v16 }
 0x25e   :  { %v856_v9 = vpop.permute.xlu1 %855 }
 0x25f   :  { %v935_v5 = vadd.f32 %v856_v9, %v795_v19  ;;  %v936_v42 = vadd.f32 %v856_v9, %v796_v21 }
 0x260   :  { %v921_v34 = vpop.permute.xlu0 %920 }
 0x261   :  { %v997_v8 = vld [vmem:[%s2048_s4 + $0x110] sm:$0xff]  ;;  %v998_v60 = vld [vmem:[%s2048_s4 + $0x118] sm:$0xff]  ;;  %v961_v40 = vadd.f32 %v921_v34, %v821_v52 }
 0x262   :  { %1091 = vst [vmem:[%s2049_s5 + $0x40] sm:$0xff] %v1051_v6  ;;  %1092 = vst [vmem:[%s2049_s5 + $0x48] sm:$0xff] %v1052_v47  ;;  %v1037_v7 = vadd.f32 %v997_v8, %v957_v59  ;;  %v1038_v49 = vadd.f32 %v998_v60, %v958_v37  ;;  %v962_v47 = vadd.f32 %v921_v34, %v822_v3  ;;  %v906_v22 = vpop.permute.xlu1 %905 }
 0x263   :  { %1111 = vst [vmem:[%s2049_s5 + $0xe0] sm:$0xff] %v1071_v62  ;;  %1112 = vst [vmem:[%s2049_s5 + $0xe8] sm:$0xff] %v1072_v29  ;;  %v955_v8 = vadd.f32 %v906_v22, %v815_v13  ;;  %v956_v60 = vadd.f32 %v906_v22, %v816_v14 }
 0x264   :  { %v1077_v10 = vmax.f32 %v1037_v7, 0.0  ;;  %v1078_v24 = vmax.f32 %v1038_v49, 0.0 }
 0x266   :  { %1117 = vst [vmem:[%s2049_s5 + $0x110] sm:$0xff] %v1077_v10  ;;  %1118 = vst [vmem:[%s2049_s5 + $0x118] sm:$0xff] %v1078_v24  ;;  %v726_v7 = vpop.permute.xlu1 %725  ;;  %v2070_v24 = vld [vmem:[#allocation6_spill] sm:$0xff] }
 0x267   :  { %v799_v23 = vmul.f32 %v726_v7, %v2070_v24  ;;  %v800_v31 = vmul.f32 %v726_v7, %v2071_v25 }
 0x26a   :  { %v776_v10 = vpop.permute.xlu1 %775 }
 0x26d   :  { %v977_v38 = vld [vmem:[%s2048_s4 + $0x70] sm:$0xff]  ;;  %v978_v61 = vld [vmem:[%s2048_s4 + $0x78] sm:$0xff]  ;;  %v975_v45 = vld [vmem:[%s2048_s4 + $0x60] sm:$0xff] }
 0x26e   :  { %v981_v26 = vld [vmem:[%s2048_s4 + $0x90] sm:$0xff]  ;;  %v982_v1 = vld [vmem:[%s2048_s4 + $0x98] sm:$0xff]  ;;  %v1017_v15 = vadd.f32 %v977_v38, %v937_v2  ;;  %v1018_v17 = vadd.f32 %v978_v61, %v938_v32  ;;  %v976_v55 = vld [vmem:[%s2048_s4 + $0x68] sm:$0xff]  ;;  %v1015_v4 = vadd.f32 %v975_v45, %v935_v5  ;;  %v866_v38 = vpop.permute.xlu1 %865 }
 0x26f   :  { %v1021_v50 = vadd.f32 %v981_v26, %v941_v51  ;;  %v1022_v43 = vadd.f32 %v982_v1, %v942_v56  ;;  %v1001_v12 = vld [vmem:[%s2048_s4 + $0x130] sm:$0xff]  ;;  %v1002_v20 = vld [vmem:[%s2048_s4 + $0x138] sm:$0xff]  ;;  %v1016_v6 = vadd.f32 %v976_v55, %v936_v42  ;;  %v995_v0 = vld [vmem:[%s2048_s4 + $0x100] sm:$0xff]  ;;  %v939_v18 = vadd.f32 %v866_v38, %v799_v23 }
 0x270   :  { %v1057_v30 = vmax.f32 %v1017_v15, 0.0  ;;  %v1058_v63 = vmax.f32 %v1018_v17, 0.0  ;;  %v996_v54 = vld [vmem:[%s2048_s4 + $0x108] sm:$0xff]  ;;  %v1055_v28 = vmax.f32 %v1015_v4, 0.0  ;;  %v1041_v46 = vadd.f32 %v1001_v12, %v961_v40  ;;  %v2073_v1 = vld [vmem:[#allocation9_spill] sm:$0xff] }
 0x271   :  { %v1061_v48 = vmax.f32 %v1021_v50, 0.0  ;;  %v1062_v27 = vmax.f32 %v1022_v43, 0.0  ;;  %v1056_v44 = vmax.f32 %v1016_v6, 0.0  ;;  %v1042_v59 = vadd.f32 %v1002_v20, %v962_v47  ;;  %v2072_v61 = vld [vmem:[#allocation7_spill] sm:$0xff] }
 0x272   :  { %1097 = vst [vmem:[%s2049_s5 + $0x70] sm:$0xff] %v1057_v30  ;;  %1098 = vst [vmem:[%s2049_s5 + $0x78] sm:$0xff] %v1058_v63  ;;  %v1035_v37 = vadd.f32 %v995_v0, %v955_v8  ;;  %v1036_v36 = vadd.f32 %v996_v54, %v956_v60  ;;  %v1081_v62 = vmax.f32 %v1041_v46, 0.0  ;;  %v940_v57 = vadd.f32 %v866_v38, %v800_v31  ;;  %v916_v41 = vpop.permute.xlu1 %915 }
 0x273   :  { %1101 = vst [vmem:[%s2049_s5 + $0x90] sm:$0xff] %v1061_v48  ;;  %1102 = vst [vmem:[%s2049_s5 + $0x98] sm:$0xff] %v1062_v27  ;;  %v1082_v29 = vmax.f32 %v1042_v59, 0.0  ;;  %v819_v26 = vmul.f32 %v776_v10, %v2072_v61  ;;  %v820_v58 = vmul.f32 %v776_v10, %v2073_v1 }
 0x274   :  { %1095 = vst [vmem:[%s2049_s5 + $0x60] sm:$0xff] %v1055_v28  ;;  %1096 = vst [vmem:[%s2049_s5 + $0x68] sm:$0xff] %v1056_v44  ;;  %v1075_v49 = vmax.f32 %v1035_v37, 0.0  ;;  %v1076_v39 = vmax.f32 %v1036_v36, 0.0 }
 0x275   :  { %1121 = vst [vmem:[%s2049_s5 + $0x130] sm:$0xff] %v1081_v62  ;;  %1122 = vst [vmem:[%s2049_s5 + $0x138] sm:$0xff] %v1082_v29  ;;  %v959_v21 = vadd.f32 %v916_v41, %v819_v26  ;;  %v960_v35 = vadd.f32 %v916_v41, %v820_v58 }
 0x276   :  { %1115 = vst [vmem:[%s2049_s5 + $0x100] sm:$0xff] %v1075_v49  ;;  %1116 = vst [vmem:[%s2049_s5 + $0x108] sm:$0xff] %v1076_v39 }
 0x27d   :  { %v979_v11 = vld [vmem:[%s2048_s4 + $0x80] sm:$0xff]  ;;  %v980_v16 = vld [vmem:[%s2048_s4 + $0x88] sm:$0xff] }
 0x27e   :  { %v1019_v2 = vadd.f32 %v979_v11, %v939_v18  ;;  %v1020_v32 = vadd.f32 %v980_v16, %v940_v57  ;;  %v999_v51 = vld [vmem:[%s2048_s4 + $0x120] sm:$0xff]  ;;  %v1000_v56 = vld [vmem:[%s2048_s4 + $0x128] sm:$0xff] }
 0x27f   :  { %v1039_v13 = vadd.f32 %v999_v51, %v959_v21  ;;  %v1040_v33 = vadd.f32 %v1000_v56, %v960_v35 }
 0x280   :  { %v1059_v19 = vmax.f32 %v1019_v2, 0.0  ;;  %v1060_v53 = vmax.f32 %v1020_v32, 0.0 }
 0x281   :  { %v1079_v14 = vmax.f32 %v1039_v13, 0.0  ;;  %v1080_v9 = vmax.f32 %v1040_v33, 0.0 }
 0x282   :  { %1099 = vst [vmem:[%s2049_s5 + $0x80] sm:$0xff] %v1059_v19  ;;  %1100 = vst [vmem:[%s2049_s5 + $0x88] sm:$0xff] %v1060_v53 }
 0x283   :  { %1119 = vst [vmem:[%s2049_s5 + $0x120] sm:$0xff] %v1079_v14  ;;  %1120 = vst [vmem:[%s2049_s5 + $0x128] sm:$0xff] %v1080_v9 }

</bundles_post_ra>
